<compile_context>
chip_gen: v7x
topology: tpu7x:2x2x1
jax: 0.10.0
libtpu: 0.0.40
codegen_flags: <defaults>
</compile_context>

<pallas_src>
import jax
import jax.numpy as jnp
from jax.experimental import pallas as pl
from jax.experimental.pallas import tpu as pltpu


# ----------------------------------------------------------------------------
# Exact (erf) GELU built only from ops with guaranteed Mosaic lowerings.
# Abramowitz & Stegun 7.1.26 rational erf approximation: max abs err ~1.5e-7,
# i.e. float32-exact for practical purposes (matches torch nn.GELU default).
# TODO(synk): switch to lax.erf once erf_p lowering is guaranteed on Mosaic.
# ----------------------------------------------------------------------------
def _erf(x):
    p = 0.3275911
    a1, a2, a3, a4, a5 = (0.254829592, -0.284496736, 1.421413741,
                          -1.453152027, 1.061405429)
    ax = jnp.abs(x)
    t = 1.0 / (1.0 + p * ax)
    poly = ((((a5 * t + a4) * t + a3) * t + a2) * t + a1) * t
    y = 1.0 - poly * jnp.exp(-ax * ax)
    return jnp.where(x < 0.0, -y, y)


def _gelu_exact(x):
    return 0.5 * x * (1.0 + _erf(x * 0.7071067811865476))


# ----------------------------------------------------------------------------
# Fused FFN kernel with hidden-dim reduction:
#   x@w1 + b1 -> GELU -> @w2 (accumulated in f32 scratch) -> +b2
# ----------------------------------------------------------------------------
def _ffn_kernel(x_ref, w1_ref, b1_ref, w2_ref, b2_ref, o_ref, acc_ref):
    h_idx = pl.program_id(1)

    @pl.when(h_idx == 0)
    def _():
        acc_ref[...] = jnp.zeros_like(acc_ref)

    # (tm, D) @ (D, th) on the MXU, f32 accumulate.
    h = jnp.dot(x_ref[...], w1_ref[...], preferred_element_type=jnp.float32)
    h = _gelu_exact(h + b1_ref[...])       # elementwise; hidden under the matmuls

    # (tm, th) @ (th, D), accumulated into the resident f32 scratch.
    acc_ref[...] += jnp.dot(h.astype(w2_ref.dtype), w2_ref[...],
                            preferred_element_type=jnp.float32)

    @pl.when(h_idx == pl.num_programs(1) - 1)
    def _():
        o_ref[...] = (acc_ref[...] + b2_ref[...]).astype(o_ref.dtype)


# Fast path when the whole hidden dim fits in a single tile: no scratch,
# no init/finalize gating, one straight-line body per row tile.
def _ffn_kernel_single_h(x_ref, w1_ref, b1_ref, w2_ref, b2_ref, o_ref):
    h = jnp.dot(x_ref[...], w1_ref[...], preferred_element_type=jnp.float32)
    h = _gelu_exact(h + b1_ref[...])
    out = jnp.dot(h.astype(w2_ref.dtype), w2_ref[...],
                  preferred_element_type=jnp.float32)
    o_ref[...] = (out + b2_ref[...]).astype(o_ref.dtype)


def _pick_tile(full, target, mult):
    """Largest t <= target with full % t == 0 and t % mult == 0; else full."""
    if full <= target:
        return full
    t = (target // mult) * mult
    while t >= mult:
        if full % t == 0:
            return t
        t -= mult
    return full


def feed_forward(x, w1, b1, w2, b2, *, compute_dtype=None,
                 row_tile=256, hidden_tile=512):
    """FeedForward forward pass.  x: (..., dim); w1: (dim, H); w2: (H, dim)."""
    orig_shape = x.shape
    D = orig_shape[-1]
    H = w1.shape[1]
    x2d = x.reshape(-1, D)
    M = x2d.shape[0]

    # Optional bf16 MXU operands (v6e/v7x fast path); accumulation stays f32.
    if compute_dtype is not None:
        x2d = x2d.astype(compute_dtype)
        w1 = w1.astype(compute_dtype)
        w2 = w2.astype(compute_dtype)

    # Pad rows to a sublane multiple so row tiles can stay (8,·)-aligned.
    M_pad = M
    if M > 8 and M % 8 != 0:
        M_pad = ((M + 7) // 8) * 8
        x2d = jnp.pad(x2d, ((0, M_pad - M), (0, 0)))

    # Tile sizes: modest targets so double-buffered operands + (tm, D) f32
    # accumulator comfortably fit v7x's 64 MiB VMEM as well as v5e/v6e.
    tm = _pick_tile(M_pad, row_tile, 8)       # row tile (sublane multiple of 8)
    th = _pick_tile(H, hidden_tile, 128)      # hidden tile (lane multiple of 128)
    n_h = H // th

    b1_2d = b1.reshape(1, H).astype(jnp.float32)
    b2_2d = b2.reshape(1, D).astype(jnp.float32)

    common_in_specs = [
        pl.BlockSpec((tm, D), lambda i, h: (i, 0)),   # x rows
        pl.BlockSpec((D, th), lambda i, h: (0, h)),   # w1 column tile
        pl.BlockSpec((1, th), lambda i, h: (0, h)),   # b1 tile
        pl.BlockSpec((th, D), lambda i, h: (h, 0)),   # w2 row tile
        pl.BlockSpec((1, D), lambda i, h: (0, 0)),    # b2
    ]
    out_spec = pl.BlockSpec((tm, D), lambda i, h: (i, 0))

    if n_h == 1:
        kernel, scratch = _ffn_kernel_single_h, []
    else:
        kernel, scratch = _ffn_kernel, [pltpu.VMEM((tm, D), jnp.float32)]

    out = pl.pallas_call(
        kernel,
        out_shape=jax.ShapeDtypeStruct((M_pad, D), x.dtype),
        grid_spec=pltpu.PrefetchScalarGridSpec(
            num_scalar_prefetch=0,
            grid=(M_pad // tm, n_h),
            in_specs=common_in_specs,
            out_specs=out_spec,
            scratch_shapes=scratch,
        ),
        compiler_params=pltpu.CompilerParams(
            dimension_semantics=("parallel", "arbitrary")),
    )(x2d, w1, b1_2d, w2, b2_2d)

    if M_pad != M:
        out = out[:M]
    return out.reshape(orig_shape)


# ----------------------------------------------------------------------------
# Main
# ----------------------------------------------------------------------------
if __name__ == "__main__":
    # Small shapes consistent with the module: x is (batch, tokens, dim).
    B, N, dim, hidden_dim = 2, 8, 32, 64

    key = jax.random.PRNGKey(0)
    kx, k1, k2, kb1, kb2 = jax.random.split(key, 5)
    x = jax.random.normal(kx, (B, N, dim), jnp.float32)
    w1 = 0.02 * jax.random.normal(k1, (dim, hidden_dim), jnp.float32)
    b1 = 0.01 * jax.random.normal(kb1, (hidden_dim,), jnp.float32)
    w2 = 0.02 * jax.random.normal(k2, (hidden_dim, dim), jnp.float32)
    b2 = 0.01 * jax.random.normal(kb2, (dim,), jnp.float32)

    fwd = jax.jit(feed_forward)
    out = jax.block_until_ready(fwd(x, w1, b1, w2, b2))

    # Pure-JAX reference (Dropout(p=0.0) is identity; GELU exact/erf).
    ref = jax.nn.gelu(x @ w1 + b1, approximate=False) @ w2 + b2

    assert out.shape == x.shape
    assert bool(jnp.all(jnp.isfinite(out)))
    assert bool(jnp.allclose(out, ref, rtol=1e-4, atol=1e-4))
    print("KERNEL_OK")
</pallas_src>

<mosaic_0001>
module attributes {stable_mosaic.version = 11 : i64} {
  func.func @_ffn_kernel_single_h(%arg0: i32, %arg1: i32, %arg2: memref<16x32xf32, #tpu.memory_space<vmem>>, %arg3: memref<32x64xf32, #tpu.memory_space<vmem>>, %arg4: memref<1x64xf32, #tpu.memory_space<vmem>>, %arg5: memref<64x32xf32, #tpu.memory_space<vmem>>, %arg6: memref<1x32xf32, #tpu.memory_space<vmem>>, %arg7: memref<16x32xf32, #tpu.memory_space<vmem>>) attributes {dimension_semantics = [#tpu.dimension_semantics<parallel>, #tpu.dimension_semantics<arbitrary>], iteration_bounds = array<i64: 1, 1>, scalar_prefetch = 0 : i64, scratch_operands = 0 : i64, tpu.core_type = #tpu.core_type<tc>, window_params = [{transform_indices = @transform_0, window_bounds = array<i64: 16, 32>}, {transform_indices = @transform_1, window_bounds = array<i64: 32, 64>}, {transform_indices = @transform_2, window_bounds = array<i64: 1, 64>}, {transform_indices = @transform_3, window_bounds = array<i64: 64, 32>}, {pipeline_mode = #tpu.pipeline_mode<synchronous>, transform_indices = @transform_4, window_bounds = array<i64: 1, 32>}, {transform_indices = @transform_5, window_bounds = array<i64: 16, 32>}]} {
    %c0 = arith.constant 0 : index
    %c0_0 = arith.constant 0 : index
    %0 = vector.load %arg2[%c0, %c0_0] : memref<16x32xf32, #tpu.memory_space<vmem>>, vector<16x32xf32>
    %c0_1 = arith.constant 0 : index
    %c0_2 = arith.constant 0 : index
    %1 = vector.load %arg3[%c0_1, %c0_2] : memref<32x64xf32, #tpu.memory_space<vmem>>, vector<32x64xf32>
    %cst = arith.constant dense<0.000000e+00> : vector<16x64xf32>
    %2 = tpu.matmul %0, %1, %cst {dimension_numbers = #tpu.dot_dimension_numbers<[1], [0], [0], [1], [0, 0, 1, 1], [], []>} : vector<16x32xf32>, vector<32x64xf32>, vector<16x64xf32> -> vector<16x64xf32>
    %c0_3 = arith.constant 0 : index
    %c0_4 = arith.constant 0 : index
    %3 = vector.load %arg4[%c0_3, %c0_4] : memref<1x64xf32, #tpu.memory_space<vmem>>, vector<1x64xf32>
    %4 = vector.broadcast %3 : vector<1x64xf32> to vector<16x64xf32>
    %5 = arith.addf %2, %4 : vector<16x64xf32>
    %cst_5 = arith.constant 5.000000e-01 : f32
    %6 = vector.broadcast %cst_5 : f32 to vector<16x64xf32>
    %7 = arith.mulf %6, %5 : vector<16x64xf32>
    %cst_6 = arith.constant 0.707106769 : f32
    %8 = vector.broadcast %cst_6 : f32 to vector<16x64xf32>
    %9 = arith.mulf %5, %8 : vector<16x64xf32>
    %10 = math.absf %9 : vector<16x64xf32>
    %cst_7 = arith.constant 0.327591091 : f32
    %11 = vector.broadcast %cst_7 : f32 to vector<16x64xf32>
    %12 = arith.mulf %11, %10 : vector<16x64xf32>
    %cst_8 = arith.constant 1.000000e+00 : f32
    %13 = vector.broadcast %cst_8 : f32 to vector<16x64xf32>
    %14 = arith.addf %13, %12 : vector<16x64xf32>
    %cst_9 = arith.constant 1.000000e+00 : f32
    %15 = vector.broadcast %cst_9 : f32 to vector<16x64xf32>
    %16 = arith.divf %15, %14 : vector<16x64xf32>
    %cst_10 = arith.constant 1.06140542 : f32
    %17 = vector.broadcast %cst_10 : f32 to vector<16x64xf32>
    %18 = arith.mulf %17, %16 : vector<16x64xf32>
    %cst_11 = arith.constant -1.45315206 : f32
    %19 = vector.broadcast %cst_11 : f32 to vector<16x64xf32>
    %20 = arith.addf %18, %19 : vector<16x64xf32>
    %21 = arith.mulf %20, %16 : vector<16x64xf32>
    %cst_12 = arith.constant 1.42141378 : f32
    %22 = vector.broadcast %cst_12 : f32 to vector<16x64xf32>
    %23 = arith.addf %21, %22 : vector<16x64xf32>
    %24 = arith.mulf %23, %16 : vector<16x64xf32>
    %cst_13 = arith.constant -0.284496725 : f32
    %25 = vector.broadcast %cst_13 : f32 to vector<16x64xf32>
    %26 = arith.addf %24, %25 : vector<16x64xf32>
    %27 = arith.mulf %26, %16 : vector<16x64xf32>
    %cst_14 = arith.constant 0.254829586 : f32
    %28 = vector.broadcast %cst_14 : f32 to vector<16x64xf32>
    %29 = arith.addf %27, %28 : vector<16x64xf32>
    %30 = arith.mulf %29, %16 : vector<16x64xf32>
    %cst_15 = arith.constant 0.000000e+00 : f32
    %31 = vector.broadcast %cst_15 : f32 to vector<16x64xf32>
    %32 = arith.subf %31, %10 : vector<16x64xf32>
    %33 = arith.mulf %32, %10 : vector<16x64xf32>
    %34 = math.exp %33 : vector<16x64xf32>
    %35 = arith.mulf %30, %34 : vector<16x64xf32>
    %cst_16 = arith.constant 1.000000e+00 : f32
    %36 = vector.broadcast %cst_16 : f32 to vector<16x64xf32>
    %37 = arith.subf %36, %35 : vector<16x64xf32>
    %cst_17 = arith.constant 0.000000e+00 : f32
    %38 = vector.broadcast %cst_17 : f32 to vector<16x64xf32>
    %39 = arith.cmpf olt, %9, %38 : vector<16x64xf32>
    %cst_18 = arith.constant 0.000000e+00 : f32
    %40 = vector.broadcast %cst_18 : f32 to vector<16x64xf32>
    %41 = arith.subf %40, %37 : vector<16x64xf32>
    %42 = arith.select %39, %41, %37 : vector<16x64xi1>, vector<16x64xf32>
    %cst_19 = arith.constant 1.000000e+00 : f32
    %43 = vector.broadcast %cst_19 : f32 to vector<16x64xf32>
    %44 = arith.addf %43, %42 : vector<16x64xf32>
    %45 = arith.mulf %7, %44 : vector<16x64xf32>
    %c0_20 = arith.constant 0 : index
    %c0_21 = arith.constant 0 : index
    %46 = vector.load %arg5[%c0_20, %c0_21] : memref<64x32xf32, #tpu.memory_space<vmem>>, vector<64x32xf32>
    %cst_22 = arith.constant dense<0.000000e+00> : vector<16x32xf32>
    %47 = tpu.matmul %45, %46, %cst_22 {dimension_numbers = #tpu.dot_dimension_numbers<[1], [0], [0], [1], [0, 0, 1, 1], [], []>} : vector<16x64xf32>, vector<64x32xf32>, vector<16x32xf32> -> vector<16x32xf32>
    %c0_23 = arith.constant 0 : index
    %c0_24 = arith.constant 0 : index
    %48 = vector.load %arg6[%c0_23, %c0_24] : memref<1x32xf32, #tpu.memory_space<vmem>>, vector<1x32xf32>
    %49 = vector.broadcast %48 : vector<1x32xf32> to vector<16x32xf32>
    %50 = arith.addf %47, %49 : vector<16x32xf32>
    %c0_25 = arith.constant 0 : index
    %c0_26 = arith.constant 0 : index
    %51 = vector.load %arg7[%c0_25, %c0_26] : memref<16x32xf32, #tpu.memory_space<vmem>>, vector<16x32xf32>
    tpu.vector_store %arg7[%c0_25, %c0_26], %50 {strides = array<i32>} : memref<16x32xf32, #tpu.memory_space<vmem>>, vector<16x32xf32>,
    return
  }
  func.func @transform_0(%arg0: i32, %arg1: i32) -> (i32, i32) {
    %c0_i32 = arith.constant 0 : i32
    %c0_i32_0 = arith.constant 0 : i32
    return %arg0, %c0_i32 : i32, i32
  }
  func.func @transform_1(%arg0: i32, %arg1: i32) -> (i32, i32) {
    %c0_i32 = arith.constant 0 : i32
    %c0_i32_0 = arith.constant 0 : i32
    return %c0_i32, %arg1 : i32, i32
  }
  func.func @transform_2(%arg0: i32, %arg1: i32) -> (i32, i32) {
    %c0_i32 = arith.constant 0 : i32
    %c0_i32_0 = arith.constant 0 : i32
    return %c0_i32, %arg1 : i32, i32
  }
  func.func @transform_3(%arg0: i32, %arg1: i32) -> (i32, i32) {
    %c0_i32 = arith.constant 0 : i32
    %c0_i32_0 = arith.constant 0 : i32
    return %arg1, %c0_i32 : i32, i32
  }
  func.func @transform_4(%arg0: i32, %arg1: i32) -> (i32, i32) {
    %c0_i32 = arith.constant 0 : i32
    %c0_i32_0 = arith.constant 0 : i32
    %c0_i32_1 = arith.constant 0 : i32
    return %c0_i32, %c0_i32_0 : i32, i32
  }
  func.func @transform_5(%arg0: i32, %arg1: i32) -> (i32, i32) {
    %c0_i32 = arith.constant 0 : i32
    %c0_i32_0 = arith.constant 0 : i32
    return %arg0, %c0_i32 : i32, i32
  }
}

</mosaic_0001>

<bundles_post_ra>
// kernel: feed_forward.1
= control target key start
LH: loop header
LB: loop body
LE: loop exit
PB: predicated region body
PF: predicated region fallthrough
CT: control target
= control target key end

     0   :  { %vm34_vm0 = vcmask 261120   ;;  %s493_s0 = inlined_call_operand.vmem [shape: f32[16,32], index: 0, kind: input, shape index: {}]   ;;  %s494_s1 = inlined_call_operand.vmem [shape: f32[32,64], index: 1, kind: input, shape index: {}]   ;;  %s495_s2 = inlined_call_operand.vmem [shape: f32[1,64], index: 2, kind: input, shape index: {}]   ;;  %s496_s3 = inlined_call_operand.vmem [shape: f32[64,32], index: 3, kind: input, shape index: {}]   ;;  %s497_s4 = inlined_call_operand.vmem [shape: f32[1,32], index: 4, kind: input, shape index: {}]   ;;  %s498_s5 = inlined_call_operand.hbm [shape: f32[16,32], index: 5, kind: output, shape index: {}]  }
   0x1   :  { %v23_v0 = vld [vmem:[%s494_s1] sm:$0xff]  ;;  %v24_v1 = vld [vmem:[%s494_s1 + $0x8] sm:$0xff]  ;;  %v25_v2 = vld [vmem:[%s494_s1 + $0x10] sm:$0xff] }
   0x2   :  { %v337_v3 = vpack.c.bf16 %v24_v1, %v23_v0  ;;  %v26_v4 = vld [vmem:[%s494_s1 + $0x18] sm:$0xff]  ;;  %v21_v5 = vld [vmem:[%s493_s0] sm:$0xff] }
   0x3   :  { %v341_v6 = vpack.c.bf16 %v26_v4, %v25_v2  ;;  %315 = vmatprep.mubr.msk.f32.mxu0 %vm34_vm0, %v21_v5 }
   0x4   :  { %10 = vsyncpa [#allocation3], 0  ;;  %338 = vmatprep.subr.bf16.mxu0 %v337_v3  ;;  %v22_v7 = vld [vmem:[%s493_s0 + $0x8] sm:$0xff]  ;;  %v170_v8 = vld [vmem:[%s496_s3] sm:$0xff]  ;;  %vm185_vm3 = vcmask 523264   ;;  %s396_s21 = smov [#allocation2]  }
   0x5   :  { %340 = vmatpush3.bf16.msra.mxu0 %v337_v3  ;;  %v171_v9 = vld [vmem:[%s496_s3 + $0x8] sm:$0xff]  ;;  %v172_v11 = vld [vmem:[%s496_s3 + $0x10] sm:$0xff]  ;;  %v173_v12 = vld [vmem:[%s496_s3 + $0x18] sm:$0xff]  ;;  %s274_s22 = sshll.u32 %s396_s21, 4  ;;  %s275_s22 = int_to_ptr.vmem [resolvable:$true] %s274_s22 }
   0x6   :  { %342 = vmatprep.subr.bf16.mxu0 %v341_v6  ;;  %v345_v10 = vpack.c.bf16 %v171_v9, %v170_v8  ;;  %v349_v13 = vpack.c.bf16 %v173_v12, %v172_v11  ;;  %v174_v14 = vld [vmem:[%s496_s3 + $0x20] sm:$0xff]  ;;  %v175_v15 = vld [vmem:[%s496_s3 + $0x28] sm:$0xff]  ;;  %v176_v17 = vld [vmem:[%s496_s3 + $0x30] sm:$0xff]  ;;  %s372_s23 = scalar_lea.vmem %s275_s22, 256  ;;  %p377_p1 = scmp.lt.s32.totalorder %s275_s22, %s275_s22 }
   0x7   :  { %v353_v16 = vpack.c.bf16 %v175_v15, %v174_v14  ;;  %v177_v18 = vld [vmem:[%s496_s3 + $0x38] sm:$0xff]  ;;  %v285_v20 = vld [vmem:[%s495_s2] ss:$0 sm:$0xff]  ;;  %p373_p0 = scmp.ne.s32.totalorder %s275_s22, %s372_s23  ;;  %p378_p2 = scmp.lt.s32.totalorder %s372_s23, %s372_s23 }
   0x8   :  { %346 = vmatprep.subr.bf16.mxu1 %v345_v10  ;;  %v357_v19 = vpack.c.bf16 %v177_v18, %v176_v17  ;;  %v288_v11 = vld [vmem:[%s497_s4] ss:$0 sm:$0xff] }
   0x9   :  { %344 = vmatpush3.bf16.msra.mxu0 %v341_v6  ;;  %348 = vmatpush3.bf16.msra.mxu1 %v345_v10  ;;  %p379_p3 = por %p378_p2, %p377_p1 }
   0xa   :  { %350 = vmatprep.subr.bf16.mxu1 %v349_v13 }
   0xb   :  { %p380_p4 = pnand %p379_p3, %p373_p0 }
   0xc   :  { %316 = vmatmul.mubr.msk.f32.vlgmr.msra.gmra.mrb[0].mxu0 %vm34_vm0, %v22_v7 }
   0xd   :  { %352 = vmatpush3.bf16.msra.mxu1 %v349_v13 }
   0xe   :  { %354 = vmatprep.subr.bf16.mxu1 %v353_v16 }
  0x11   :  { %356 = vmatpush3.bf16.msra.mxu1 %v353_v16 }
  0x12   :  { %358 = vmatprep.subr.bf16.mxu1 %v357_v19 }
  0x15   :  { %360 = vmatpush3.bf16.msra.mxu1 %v357_v19 }
  0xdf   :  { %v317_v21 = vpop.f32.mrb[0].mxu0 }
  0xe0   :  { %v113_v22 = vadd.f32 %v317_v21, %v285_v20  ;;  %v107_v23 = vpop.f32.mrb[1].mxu0 }
  0xe1   :  { %v108_v24 = vadd.f32 %v285_v20, %v107_v23 }
  0xe2   :  { %v119_v25 = vmul.f32 0.70710677, %v113_v22  ;;  %v117_v8 = vmul.f32 0.5, %v113_v22 }
  0xe3   :  { %v118_v26 = vmul.f32 0.70710677, %v108_v24  ;;  %v116_v6 = vmul.f32 0.5, %v108_v24 }
  0xe4   :  { %v121_v27 = vand.u32 2147483647, %v119_v25  ;;  %vm161_vm1 = vcmp.lt.f32.partialorder %v119_v25, 0.0 }
  0xe5   :  { %v120_v28 = vand.u32 2147483647, %v118_v26  ;;  %vm160_vm2 = vcmp.lt.f32.partialorder %v118_v26, 0.0 }
  0xe6   :  { %v123_v29 = vmul.f32 0.3275911, %v121_v27  ;;  %v149_v33 = vsub.f32 0.0, %v121_v27 }
  0xe7   :  { %v122_v30 = vmul.f32 0.3275911, %v120_v28  ;;  %v148_v34 = vsub.f32 0.0, %v120_v28 }
  0xe8   :  { %v125_v31 = vadd.f32 1.0, %v123_v29  ;;  %v151_v36 = vmul.f32 %v149_v33, %v121_v27 }
  0xe9   :  { %v124_v32 = vadd.f32 1.0, %v122_v30  ;;  %v150_v39 = vmul.f32 %v148_v34, %v120_v28 }
  0xea   :  { %364 = vrcp.f32 %v125_v31  ;;  %v154_v42 = vmul.f32 1.442695, %v151_v36 }
  0xeb   :  { %366 = vrcp.f32 %v124_v32  ;;  %v152_v45 = vmul.f32 1.442695, %v150_v39 }
  0xec   :  { %368 = vpow2.f32 %v154_v42 }
  0xed   :  { %370 = vpow2.f32 %v152_v45 }
  0xf4   :  { %v365_v35 = vpop.eup %364 }
  0xf5   :  { %v367_v37 = vpop.eup %366  ;;  %v131_v38 = vmul.f32 1.0614054, %v365_v35 }
  0xf6   :  { %v130_v40 = vmul.f32 1.0614054, %v367_v37  ;;  %v369_v58 = vpop.eup %368 }
  0xf7   :  { %v133_v41 = vadd.f32 -1.4531521, %v131_v38  ;;  %v371_v60 = vpop.eup %370 }
  0xf8   :  { %v132_v43 = vadd.f32 -1.4531521, %v130_v40 }
  0xf9   :  { %v135_v44 = vmul.f32 %v365_v35, %v133_v41 }
  0xfa   :  { %v134_v46 = vmul.f32 %v367_v37, %v132_v43 }
  0xfb   :  { %v137_v47 = vadd.f32 1.4214138, %v135_v44 }
  0xfc   :  { %v136_v48 = vadd.f32 1.4214138, %v134_v46 }
  0xfd   :  { %v139_v49 = vmul.f32 %v365_v35, %v137_v47 }
  0xfe   :  { %v138_v50 = vmul.f32 %v367_v37, %v136_v48 }
  0xff   :  { %v141_v51 = vadd.f32 -0.28449672, %v139_v49 }
 0x100   :  { %v140_v52 = vadd.f32 -0.28449672, %v138_v50 }
 0x101   :  { %v143_v53 = vmul.f32 %v365_v35, %v141_v51 }
 0x102   :  { %v142_v54 = vmul.f32 %v367_v37, %v140_v52 }
 0x103   :  { %v145_v55 = vadd.f32 0.2548296, %v143_v53 }
 0x104   :  { %v144_v56 = vadd.f32 0.2548296, %v142_v54 }
 0x105   :  { %v147_v57 = vmul.f32 %v365_v35, %v145_v55 }
 0x106   :  { %v146_v59 = vmul.f32 %v367_v37, %v144_v56 }
 0x107   :  { %v157_v61 = vmul.f32 %v369_v58, %v147_v57 }
 0x108   :  { %v156_v62 = vmul.f32 %v371_v60, %v146_v59 }
 0x109   :  { %v159_v63 = vsub.f32 1.0, %v157_v61 }
 0x10a   :  { %v158_v0 = vsub.f32 1.0, %v156_v62 }
 0x10b   :  { %v163_v1 = vsub.f32 0.0, %v159_v63 }
 0x10c   :  { %v162_v2 = vsub.f32 0.0, %v158_v0 }
 0x10d   :  { %v165_v3 = vsel %vm161_vm1, %v163_v1, %v159_v63 }
 0x10e   :  { %v167_v4 = vadd.f32 1.0, %v165_v3  ;;  %v164_v5 = vsel %vm160_vm2, %v162_v2, %v158_v0 }
 0x10f   :  { %v166_v7 = vadd.f32 1.0, %v164_v5 }
 0x110   :  { %v169_v10 = vmul.f32 %v167_v4, %v117_v8 }
 0x111   :  { %v168_v9 = vmul.f32 %v166_v7, %v116_v6 }
 0x113   :  { %334 = vmatprep.mubr.msk.f32.mxu1 %vm185_vm3, %v168_v9 }
 0x114   :  { %335 = vmatmul.mubr.msk.f32.vlgmr.msra.gmra.mrb[0].mxu1 %vm185_vm3, %v169_v10 }
 0x1e7   :  { %v336_v12 = vpop.f32.mrb[0].mxu1 }
 0x1e8   :  { %v264_v13 = vadd.f32 %v336_v12, %v288_v11  ;;  %v258_v14 = vpop.f32.mrb[1].mxu1 }
 0x1e9   :  { %v259_v15 = vadd.f32 %v288_v11, %v258_v14 }
 0x1ea   :  { %268 = vst.msk [vmem:[#allocation2 + $0x8] sm:$0xff] %vm34_vm0, %v264_v13 }
 0x1eb   :  { %267 = vst.msk [vmem:[#allocation2] sm:$0xff] %vm34_vm0, %v259_v15 }
 0x1ec   :  { %383 = shalt.err (!%p380_p4)
}
 0x1ed   :  { %s384_s25 = scalar_lea.hbm %s498_s5, 256 }
 0x1ee   :  { %p385_p5 = scmp.ne.s32.totalorder %s498_s5, %s384_s25  ;;  %p388_p6 = scmp.lt.u32.totalorder %s384_s25, %s498_s5 }
 0x1f0   :  { %p390_p7 = pnand %p388_p6, %p385_p5 }
 0x1f2   :  { %393 = shalt.err (!%p390_p7)
}
 0x1f3   :  { %s397_s30 = smov 128   ;;  %s398_s1 = smov 8  }
 0x1f4   :  { %280 = dma.vmem_to_hbm [thread:$0]  %s275_s22, 256, %s498_s5, [#allocation3], %s397_s30, %s397_s30, %s398_s1  }
 0x1f5   :  { %394 = dma.done.wait [#allocation3], 256  }
 0x1f6   :  { %395 = vsyncadd [#allocation3], 4294967040 }
 0x1f7   :  { %284 = vsyncpa [#allocation3], 1 }

</bundles_post_ra>
